<compile_context>
chip_gen: v7x
topology: tpu7x:2x2x1
jax: 0.10.0
libtpu: 0.0.40
codegen_flags: <defaults>
</compile_context>

<pallas_src>
import functools

import jax
import jax.numpy as jnp
from jax.experimental import pallas as pl
from jax.experimental.pallas import tpu as pltpu


def _tv_loss_kernel(m_ref, x_ref, partial_ref, *, width):
    """Partial TV sum over a (TP, HWp) slab of flattened planes.

    m_ref:       (2, HWp) resident 0/1 weights:
                   row 0: W-neighbour validity (k % W != 0, k < HW)
                   row 1: H-neighbour validity (k >= W,      k < HW)
    x_ref:       (TP, HWp) block of flattened planes (lane-dense).
    partial_ref: (1, 1) f32 partial sum for this block.
    """
    x = x_ref[...].astype(m_ref.dtype)       # bf16 stays packed; else f32
    my = m_ref[0:1, :]
    mx = m_ref[1:2, :]
    # Sequential accumulation: ~2 live block-sized temporaries.
    acc = jnp.abs(x - pltpu.roll(x, shift=1, axis=1)) * my
    acc = acc + jnp.abs(x - pltpu.roll(x, shift=width, axis=1)) * mx
    partial_ref[...] = jnp.sum(acc.astype(jnp.float32)).reshape(1, 1)


def _pick_planes_per_block(num_planes, plane_bytes, target_bytes, min_grid=4):
    """Planes per block: as big as the byte budget allows, while keeping at
    least `min_grid` grid steps (pipelining / v7x 2-TC sharding) and rounding
    to a sublane-friendly multiple of 8 when large."""
    tp = max(1, int(target_bytes // plane_bytes))        # byte cap
    tp = min(tp, max(1, -(-num_planes // min_grid)))     # keep >= min_grid steps
    tp = min(tp, num_planes)
    if tp > 8:
        tp -= tp % 8                                     # sublane-aligned tiles
    return max(tp, 1)


def _default_vmem_limit_bytes():
    cap = 64 * 1024 * 1024                  # conservative: v7x per-TC VMEM
    try:
        info = pltpu.get_tpu_info()
        cap = int(getattr(info, "vmem_capacity_bytes", cap)) or cap
    except Exception:
        pass
    # Leave headroom below physical capacity; never ask for more than 96 MiB.
    return int(min((cap * 3) // 4, 96 * 1024 * 1024))


def tv_loss(x, strength, *, target_block_bytes=None, vmem_limit_bytes=None):
    """Returns (input_unchanged, scalar_loss), mimicking TVLoss.forward + .loss."""
    N, C, H, W = x.shape
    P = N * C
    HW = H * W

    if vmem_limit_bytes is None:
        vmem_limit_bytes = _default_vmem_limit_bytes()
    if target_block_bytes is None:
        # block x (double buffer + ~2-3 roll/acc temporaries) must fit the
        # scoped limit on every generation (v7x: 64 MiB per TensorCore).
        target_block_bytes = max(1 << 20, min(8 << 20, vmem_limit_bytes // 8))

    # Lane padding: keep flattened planes a multiple of 128 lanes; padded
    # lanes are zero and killed by the masks.
    HWp = -(-HW // 128) * 128
    itemsize = jnp.dtype(x.dtype).itemsize
    plane_bytes = HWp * itemsize
    # TODO(synk): if a single (H, W) plane ever exceeds target_block_bytes,
    # also tile H (needs a 1-row seam pass); not needed at feature-map sizes.
    tp = _pick_planes_per_block(P, plane_bytes, target_block_bytes)
    P_pad = -(-P // tp) * tp                 # zero-padded planes contribute 0
    G = P_pad // tp

    compute_dtype = jnp.bfloat16 if x.dtype == jnp.bfloat16 else jnp.float32

    # Flatten planes onto the lane axis; contiguous reshape + (cheap) zero pad.
    x2 = x.reshape(P, HW)
    if P_pad != P or HWp != HW:
        x2 = jnp.pad(x2, ((0, P_pad - P), (0, HWp - HW)))
    x3 = x2.reshape(G, tp, HWp)

    # Validity weights, precomputed once and resident in VMEM across the grid:
    #   row 0 -> PyTorch y_diff (dim 3): valid where k % W != 0
    #   row 1 -> PyTorch x_diff (dim 2): valid where k >= W
    # both also zero out any lane padding (k >= HW).
    k = jnp.arange(HWp, dtype=jnp.int32)
    in_plane = k < HW
    masks = jnp.stack([(k % W != 0) & in_plane,
                       (k >= W) & in_plane]).astype(compute_dtype)

    mask_bytes = 2 * HWp * jnp.dtype(compute_dtype).itemsize
    kernel = functools.partial(_tv_loss_kernel, width=W)
    partials = pl.pallas_call(
        kernel,
        out_shape=jax.ShapeDtypeStruct((G, 1, 1), jnp.float32),
        grid=(G,),
        in_specs=[
            pl.BlockSpec((2, HWp), lambda g: (0, 0)),            # resident masks
            pl.BlockSpec((None, tp, HWp), lambda g: (g, 0, 0)),  # plane slab
        ],
        out_specs=pl.BlockSpec((None, 1, 1), lambda g: (g, 0, 0)),
        compiler_params=pltpu.CompilerParams(
            dimension_semantics=("parallel",),
            vmem_limit_bytes=int(vmem_limit_bytes)),
        cost_estimate=pl.CostEstimate(
            flops=7 * G * tp * HWp,
            transcendentals=0,
            bytes_accessed=G * tp * HWp * itemsize + mask_bytes + G * 4),
    )(masks, x3)

    loss = jnp.float32(strength) * jnp.sum(partials)
    # forward() returns the input unchanged; loss is a side computation.
    return x, loss


if __name__ == "__main__":
    key = jax.random.PRNGKey(0)
    x = jax.random.normal(key, (2, 4, 16, 16), dtype=jnp.float32)
    strength = 0.5

    out, loss = tv_loss(x, strength)
    out, loss = jax.block_until_ready((out, loss))

    # Pure-JAX reference check of the hot-path reduction.
    x_diff = x[:, :, 1:, :] - x[:, :, :-1, :]
    y_diff = x[:, :, :, 1:] - x[:, :, :, :-1]
    ref = strength * (jnp.sum(jnp.abs(x_diff)) + jnp.sum(jnp.abs(y_diff)))
    assert jnp.allclose(loss, ref, rtol=1e-5, atol=1e-5), (loss, ref)
    assert jnp.array_equal(out, x)

    print("KERNEL_OK")
</pallas_src>

<mosaic_0001>
module attributes {stable_mosaic.version = 11 : i64} {
  func.func @_tv_loss_kernel(%arg0: i32, %arg1: memref<2x256xf32, #tpu.memory_space<vmem>>, %arg2: memref<1x2x256xf32, #tpu.memory_space<vmem>>, %arg3: memref<1x1x1xf32, #tpu.memory_space<vmem>>) attributes {dimension_semantics = [#tpu.dimension_semantics<parallel>], iteration_bounds = array<i64: 4>, scalar_prefetch = 0 : i64, scratch_operands = 0 : i64, tpu.core_type = #tpu.core_type<tc>, window_params = [{pipeline_mode = #tpu.pipeline_mode<synchronous>, transform_indices = @transform_0, window_bounds = array<i64: 2, 256>}, {transform_indices = @transform_1, window_bounds = array<i64: 1, 2, 256>}, {transform_indices = @transform_2, window_bounds = array<i64: 1, 1, 1>}]} {
    %c0 = arith.constant 0 : index
    %c0_0 = arith.constant 0 : index
    %c0_1 = arith.constant 0 : index
    %0 = vector.load %arg2[%c0, %c0_0, %c0_1] : memref<1x2x256xf32, #tpu.memory_space<vmem>>, vector<1x2x256xf32>
    %1 = vector.shape_cast %0 : vector<1x2x256xf32> to vector<2x256xf32>
    %c0_2 = arith.constant 0 : index
    %c0_3 = arith.constant 0 : index
    %2 = vector.load %arg1[%c0_2, %c0_3] : memref<2x256xf32, #tpu.memory_space<vmem>>, vector<1x256xf32>
    %c1 = arith.constant 1 : index
    %c0_4 = arith.constant 0 : index
    %3 = vector.load %arg1[%c1, %c0_4] : memref<2x256xf32, #tpu.memory_space<vmem>>, vector<1x256xf32>
    %c1_i32 = arith.constant 1 : i32
    %4 = tpu.dynamic_rotate %1 by %c1_i32 dim 1 : vector<2x256xf32>, i32 -> vector<2x256xf32>
    %5 = arith.subf %1, %4 : vector<2x256xf32>
    %6 = math.absf %5 : vector<2x256xf32>
    %7 = vector.broadcast %2 : vector<1x256xf32> to vector<2x256xf32>
    %8 = arith.mulf %6, %7 : vector<2x256xf32>
    %c16_i32 = arith.constant 16 : i32
    %9 = tpu.dynamic_rotate %1 by %c16_i32 dim 1 : vector<2x256xf32>, i32 -> vector<2x256xf32>
    %10 = arith.subf %1, %9 : vector<2x256xf32>
    %11 = math.absf %10 : vector<2x256xf32>
    %12 = vector.broadcast %3 : vector<1x256xf32> to vector<2x256xf32>
    %13 = arith.mulf %11, %12 : vector<2x256xf32>
    %14 = arith.addf %8, %13 : vector<2x256xf32>
    %15 = vector.shape_cast %14 : vector<2x256xf32> to vector<1x2x256xf32>
    %cst = arith.constant dense<0.000000e+00> : vector<1xf32>
    %16 = vector.multi_reduction <add>, %15, %cst [1, 2] : vector<1x2x256xf32> to vector<1xf32>
    %17 = vector.shape_cast %16 : vector<1xf32> to vector<1x1x1xf32>
    %18 = vector.extract %17[0, 0, 0] : f32 from vector<1x1x1xf32>
    %19 = vector.broadcast %18 : f32 to vector<1x1xf32>
    %c0_5 = arith.constant 0 : index
    %c0_6 = arith.constant 0 : index
    %c0_7 = arith.constant 0 : index
    %20 = vector.load %arg3[%c0_5, %c0_6, %c0_7] : memref<1x1x1xf32, #tpu.memory_space<vmem>>, vector<1x1x1xf32>
    %21 = vector.shape_cast %20 : vector<1x1x1xf32> to vector<1x1xf32>
    %22 = vector.shape_cast %19 : vector<1x1xf32> to vector<1x1x1xf32>
    tpu.vector_store %arg3[%c0_5, %c0_6, %c0_7], %22 {strides = array<i32>} : memref<1x1x1xf32, #tpu.memory_space<vmem>>, vector<1x1x1xf32>,
    return
  }
  func.func @transform_0(%arg0: i32) -> (i32, i32) {
    %c0_i32 = arith.constant 0 : i32
    %c0_i32_0 = arith.constant 0 : i32
    %c0_i32_1 = arith.constant 0 : i32
    return %c0_i32, %c0_i32_0 : i32, i32
  }
  func.func @transform_1(%arg0: i32) -> (i32, i32, i32) {
    %c0_i32 = arith.constant 0 : i32
    %c0_i32_0 = arith.constant 0 : i32
    %c0_i32_1 = arith.constant 0 : i32
    return %arg0, %c0_i32, %c0_i32_0 : i32, i32, i32
  }
  func.func @transform_2(%arg0: i32) -> (i32, i32, i32) {
    %c0_i32 = arith.constant 0 : i32
    %c0_i32_0 = arith.constant 0 : i32
    %c0_i32_1 = arith.constant 0 : i32
    return %arg0, %c0_i32, %c0_i32_0 : i32, i32, i32
  }
}

</mosaic_0001>

<bundles_post_ra>
// kernel: tpu_custom_call.1
= control target key start
LH: loop header
LB: loop body
LE: loop exit
PB: predicated region body
PF: predicated region fallthrough
CT: control target
= control target key end

     0   :  { %7 = vsyncpa [#allocation3], 0  ;;  %s699_s0 = inlined_call_operand.hbm [shape: f32[2,256], index: 0, kind: input, shape index: {}]   ;;  %s700_s1 = inlined_call_operand.hbm [shape: f32[4,2,256], index: 1, kind: input, shape index: {}]   ;;  %s701_s2 = inlined_call_operand.vmem [shape: f32[4,1,1], index: 2, kind: output, shape index: {}]  }
   0x1   :  { %8 = vsyncpa [#allocation5], 0 }
   0x2   :  { %10 = vsyncpa [#allocation5 + $0x1], 0  ;;  %s551_s9 = smov 0   ;;  %s553_s10 = smov 0  }
   0x3   :  { %s555_s11 = smov 0   ;;  %s557_s12 = smov 0  }
   0x4 LB: > { %s570_s13 = sadd.s32 4294967295, %s529_s12   ;;  %p57_p0 = scmp.ne.s32.totalorder %s521_s10, %s517_s9  ;;  %s529_s12 = sphi %s557_s12, %s719_s12   ;;  %s525_s11 = sphi %s555_s11, %s718_s11   ;;  %s521_s10 = sphi %s553_s10, %s717_s10   ;;  %s517_s9 = sphi %s551_s9, %s716_s9  }
   0x5   : > { %p702_p1 = scmp.eq.s32.totalorder %s570_s13, 0  ;;  %p366_p2 = scmp.ge.s32.totalorder %s529_s12, 1 }
   0x6   : > { %p94_p3 = scmp.lt.s32.totalorder %s529_s12, 5  ;;  %s531_s16 = smov [#allocation2]  }
   0x7   : > { %p578_p4 = por %p702_p1, %p57_p0  ;;  %s107_s17 = sshll.u32 %s531_s16, 4  ;;  %s108_s17 = int_to_ptr.vmem [resolvable:$true] %s107_s17 }
   0x8   : > { %p582_p5 = pnand %p366_p2, %p94_p3  ;;  %s589_s18 = sadd.s32 1, %s529_s12  }
   0x9   : > { %s705_s14 = scalar_select %p578_p4, 1, 0 }
   0xa   : > { %s706_s15 = scalar_select %p582_p5, 1, 0 }
   0xb   : > { %p386_p6 = pneg %p582_p5  ;;  %s41_s20 = ssub.s32 %s529_s12, %s589_s18 }
   0xc   : > { %p599_p8 = scmp.eq.s32.totalorder %s41_s20, 0  ;;  %s44_s22 = sadd.s32 1, %s525_s11 }
   0xd   : > { %p593_p7 = pnand %p386_p6, %p702_p1  ;;  %s433_s25 = scalar_lea.hbm %s699_s0, 64 }
   0xe   : > { %s708_s21 = scalar_select %p599_p8, 1, 0 }
   0xf   : > { %p434_p10 = scmp.ne.s32.totalorder %s699_s0, %s433_s25  ;;  %p435_p11 = pneg %p593_p7 }
  0x10   : > { %p440_p0 = scmp.lt.u32.totalorder %s433_s25, %s699_s0 }
  0x11   : > { %p436_p12 = pnand %p435_p11, %p434_p10 }
  0x13   : > { %p437_p13 = pneg %p436_p12 }
  0x15   : > { %p442_p2 = pnand %p440_p0, %p437_p13 }
  0x17   : > { %445 = shalt.err (!%p442_p2)
}
  0x18   : > { %s446_s30 = scalar_lea.vmem %s108_s17, 64  ;;  %p454_p9 = scmp.lt.s32.totalorder %s108_s17, %s108_s17 }
  0x19   : > { %p447_p3 = scmp.ne.s32.totalorder %s108_s17, %s446_s30  ;;  %p455_p4 = scmp.lt.s32.totalorder %s446_s30, %s446_s30 }
  0x1b   : > { %p449_p6 = pnand %p447_p3, %p435_p11  ;;  %p456_p5 = por %p455_p4, %p454_p9 }
  0x1d   : > { %p450_p1 = pneg %p449_p6 }
  0x1f   : > { %p457_p8 = pnand %p456_p5, %p450_p1 }
  0x21   : > { %460 = shalt.err (!%p457_p8)
}
  0x22   : > { %389 = dma.hbm_to_vmem [thread:$0]  (!%p593_p7), %s699_s0, 64, %s108_s17, [#allocation3]  }
  0x23   : > { %p709_p10 = scmp.ne.s32.totalorder %s708_s21, 0  ;;  %p52_p4 = scmp.eq.s32.totalorder %s529_s12, 0 }
  0x24   : > { %p395_p1 = scmp.lt.s32.totalorder %s529_s12, 4  ;;  %s118_s6 = sand.u32 1, %s525_s11  }
  0x25   : > { %s625_s5 = scalar_select %p709_p10, %s525_s11, %s44_s22  }
  0x26   : > { %s377_s7 = sshll.u32 %s529_s12, 6  ;;  %p710_p5 = scmp.ne.s32.totalorder %s525_s11, %s521_s10 }
  0x27   : > { %s369_s8 = sshll.u32 %s118_s6, 2  ;;  %s637_s19 = scalar_lea.hbm %s700_s1, %s377_s7 }
  0x28   : > { %p53_p8 = por %p52_p4, %p710_p5  ;;  %s122_s20 = scalar_lea.vmem [#allocation4], %s369_s8 }
  0x29   : > { %s130_s12 = sshll.u32 %s122_s20, 4  ;;  %s119_s21 = scalar_lea.sflag [#allocation5], %s118_s6  ;;  %s643_s12 = int_to_ptr.vmem [resolvable:$true] %s130_s12 }
  0x2a   : > { %p639_p7 = pnand %p395_p1, %p53_p8  ;;  %s461_s22 = scalar_lea.hbm %s637_s19, 64 }
  0x2b   : > { %p462_p9 = scmp.ne.s32.totalorder %s637_s19, %s461_s22  ;;  %s466_s25 = scalar_lea.hbm %s700_s1, 256 }
  0x2c   : > { %p463_p11 = pneg %p639_p7  ;;  %p467_p0 = scmp.lt.u32.totalorder %s637_s19, %s700_s1 }
  0x2d   : > { %p468_p2 = scmp.lt.u32.totalorder %s466_s25, %s461_s22  ;;  %p470_p6 = scmp.lt.u32.totalorder %s461_s22, %s637_s19 }
  0x2e   : > { %p464_p12 = pnand %p463_p11, %p462_p9 }
  0x2f   : > { %p469_p3 = por %p468_p2, %p467_p0 }
  0x30   : > { %p465_p13 = pneg %p464_p12 }
  0x31   : > { %p471_p10 = por %p470_p6, %p469_p3 }
  0x33   : > { %p472_p4 = pnand %p471_p10, %p465_p13 }
  0x35   : > { %475 = shalt.err (!%p472_p4)
}
  0x36   : > { %s476_s28 = scalar_lea.vmem %s643_s12, 64  ;;  %s532_s29 = smov [#allocation4]  }
  0x37   : > { %p477_p1 = scmp.ne.s32.totalorder %s643_s12, %s476_s28  ;;  %s481_s30 = sshll.u32 %s532_s29, 4  ;;  %s482_s30 = int_to_ptr.vmem [resolvable:$false] %s481_s30 }
  0x38   : > { %s483_s3 = scalar_lea.vmem %s482_s30, 128  ;;  %p484_p9 = scmp.lt.s32.totalorder %s643_s12, %s482_s30 }
  0x39   : > { %p479_p5 = pnand %p477_p1, %p463_p11  ;;  %p485_p12 = scmp.lt.s32.totalorder %s483_s3, %s476_s28 }
  0x3b   : > { %p480_p8 = pneg %p479_p5  ;;  %p486_p0 = por %p485_p12, %p484_p9 }
  0x3d   : > { %p487_p2 = pnand %p486_p0, %p480_p8 }
  0x3f   : > { %490 = shalt.err (!%p487_p2)
}
  0x40   : > { %393 = dma.hbm_to_vmem [thread:$0]  (!%p639_p7), %s637_s19, 64, %s643_s12, %s119_s21  }
  0x41   : > { %p712_p13 = scmp.ne.s32.totalorder %s706_s15, 0 }
  0x42   : > { %p713_p11 = scmp.eq.s32.totalorder (!%p712_p13), %s570_s13, 0 }
  0x43   : > { %139 = sbr.rel (%p712_p13) target bundleno = 433 (0x1b1), region = 28 }
  0x4a   : > { %508 = dma.done.wait (%p713_p11), [#allocation3], 64   ;;  %p714_p3 = pmov %p713_p11 }
  0x4b   : > { %s145_s4 = sand.u32 1, %s521_s10   ;;  %p715_p6 = scmp.ne.s32.totalorder %s705_s14, 0 }
  0x4c   : > { %510 = vsyncadd (%p714_p3), [#allocation3], 4294967232  ;;  %s374_s6 = sshll.u32 %s145_s4, 2  ;;  %s146_s7 = scalar_lea.sflag [#allocation5], %s145_s4 }
  0x4d   : > { %s149_s8 = scalar_lea.vmem [#allocation4], %s374_s6 }
  0x4e   : > { %512 = dma.done.wait (%p715_p6), %s146_s7, 64  }
  0x4f   : > { %514 = vsyncadd (%p715_p6), %s146_s7, 4294967232  ;;  %v179_v0 = vlaneseq  ;;  %v533_v1 = vmov 1983009808   ;;  %v171_v6 = vld [vmem:[%s149_s8] sm:$0xf]  ;;  %s534_s15 = smov 16  }
  0x50   : > { %v177_v2 = vunpack.c.l.s4 %v533_v1  ;;  %s535_s9 = smov 1   ;;  %v172_v12 = vld [vmem:[#allocation2] ss:$2 sm:$0x3]  ;;  %vm278_vm2 = vcmask 1041408   ;;  %p168_p7 = scmp.lt.s32.totalorder %s570_s13, 3 }
  0x51   : > { %v180_v3 = vshrl.u32 %v179_v0, 7  ;;  %v191_v9 = vand.u32 127, %v179_v0  ;;  %v174_v13 = vld [vmem:[#allocation2 + $0x1] ss:$2 sm:$0x3]  ;;  %vm292_vm3 = vcmask 0  }
  0x52   : > { %v178_v4 = vunpack.c.0.s8 %v177_v2  ;;  %s721_s13 = smov (!%p168_p7, %s570_s13), 3 }
  0x53   : > { %v211_v10 = vsub.s32 0, %v180_v3  ;;  %v215_v11 = vsub.s32 1, %v180_v3  ;;  %vm231_vm0 = vcmp.lt.s32.totalorder %v191_v9, 16  ;;  %vm192_vm1 = vcmp.lt.s32.totalorder %v191_v9, 1  ;;  %s170_s19 = scalar_lea.vmem %s701_s2, %s721_s13 }
  0x54   : > { %v181_v5 = vsub.s32 %v178_v4, %v180_v3 }
  0x55   : > { %v212_v16 = vrot.slane %v172_v12, %v211_v10  ;;  %v216_v17 = vrot.slane %v172_v12, %v215_v11  ;;  %v251_v18 = vrot.slane %v174_v13, %v211_v10  ;;  %v255_v19 = vrot.slane %v174_v13, %v215_v11 }
  0x56   : > { %v182_v7 = vrot.slane %v171_v6, %v181_v5 }
  0x57   : > { %v217_v28 = vcombine.low %v212_v16, %v216_v17  ;;  %v256_v29 = vcombine.low %v251_v18, %v255_v19 }
  0x58   : > { %227 = vrot.lane.b32.xlu1 %v182_v7, %s534_s15  ;;  %186 = vrot.lane.b32.xlu0 %v182_v7, %s535_s9  ;;  %v183_v8 = vcombine.high %v182_v7, %v182_v7 }
  0x59   : > { %v224_v34 = vrot.slane %v217_v28, %v181_v5  ;;  %v263_v35 = vrot.slane %v256_v29, %v181_v5 }
  0x5c   : > { %229 = vrot.lane.b32.xlu1 %v183_v8, %s534_s15  ;;  %188 = vrot.lane.b32.xlu0 %v183_v8, %s535_s9 }
  0xca   : > { %v228_v14 = vpop.permute.xlu1 %227  ;;  %v187_v15 = vpop.permute.xlu0 %186 }
  0xce   : > { %v230_v20 = vpop.permute.xlu1 %229  ;;  %v189_v21 = vpop.permute.xlu0 %188 }
  0xcf   : > { %v232_v22 = vsel %vm231_vm0, %v228_v14, %v230_v20  ;;  %v233_v23 = vsel %vm231_vm0, %v230_v20, %v228_v14  ;;  %v193_v24 = vsel %vm192_vm1, %v187_v15, %v189_v21  ;;  %v194_v25 = vsel %vm192_vm1, %v189_v21, %v187_v15 }
  0xd0   : > { %v236_v26 = vcombine.low %v233_v23, %v232_v22  ;;  %v197_v27 = vcombine.low %v194_v25, %v193_v24 }
  0xd2   : > { %v243_v30 = vrot.slane %v236_v26, %v181_v5  ;;  %v204_v31 = vrot.slane %v197_v27, %v181_v5 }
  0xd4   : > { %v245_v32 = vsub.f32 %v171_v6, %v243_v30  ;;  %v206_v33 = vsub.f32 %v171_v6, %v204_v31 }
  0xd6   : > { %v246_v36 = vand.u32 2147483647, %v245_v32  ;;  %v207_v37 = vand.u32 2147483647, %v206_v33 }
  0xd8   : > { %v226_v38 = vmul.f32 %v224_v34, %v207_v37  ;;  %v265_v39 = vmul.f32 %v263_v35, %v246_v36 }
  0xda   : > { %v266_v40 = vadd.f32 %v265_v39, %v226_v38 }
  0xdc   : > { %v274_v41 = vrot.slane %v266_v40, %v181_v5 }
  0xde   : > { %v275_v42 = vcombine.high %v274_v41, %v274_v41  ;;  %v279_v43 = vsel %vm278_vm2, %v274_v41, 0.0 }
  0xe0   : > { %v280_v44 = vsel %vm278_vm2, %v275_v42, 0.0 }
  0xe1   : > { %v281_v45 = vadd.f32 %v280_v44, %v279_v43 }
  0xe3   : > { %282 = vadd.xlane.f32.xlu0 %v281_v45 }
 0x170   : > { %v283_v46 = vpop.xlane.xlu0 %282 }
 0x171   : > { %v284_v47 = vrot.slane %v283_v46, 4 }
 0x173   : > { %v285_v48 = vadd.f32 %v284_v47, %v283_v46 }
 0x175   : > { %v286_v49 = vrot.slane %v285_v48, 2 }
 0x177   : > { %v287_v50 = vadd.f32 %v286_v49, %v285_v48 }
 0x179   : > { %v288_v51 = vrot.slane %v287_v50, 1 }
 0x17b   : > { %v289_v52 = vadd.f32 %v288_v51, %v287_v50 }
 0x17d   : > { %378 = vpush %v289_v52 }
 0x1ae   : > { %s379_s17 = spop %378 }
 0x1af   : > { %v291_v53 = vstv %s379_s17 }
 0x1b0   : > { %293 = vst.msk [vmem:[%s170_s19] sm:$0x1] %vm292_vm3, %v291_v53 }
 0x1b1 PF: > { %p13_p10 = scmp.ge.s32.totalorder %s589_s18, 6   ;;  %s716_s9 = smov %s521_s10 }
 0x1b2   : > { %s717_s10 = smov %s525_s11  ;;  %s718_s11 = smov %s625_s5 }
 0x1b3   : > { %s719_s12 = smov %s589_s18  ;;  %15 = sbr.rel (!%p13_p10) target bundleno = 4 (0x4), region = 74 }
 0x1ba   :  { %311 = vsyncpa [#allocation3], 1 }
 0x1bb   :  { %313 = vsyncpa [#allocation3 + $0x1], 1 }
 0x1bc   :  { %314 = vsyncpa [#allocation5], 1 }
 0x1bd   :  { %316 = vsyncpa [#allocation5 + $0x1], 1 }

</bundles_post_ra>
